<compile_context>
chip_gen: v6e
topology: v6e:2x2x1
jax: 0.10.0
libtpu: 0.0.40
codegen_flags: <defaults>
</compile_context>

<pallas_src>
import jax
import jax.numpy as jnp
from jax.experimental import pallas as pl
from jax.experimental.pallas import tpu as pltpu


def _encoder_kernel(xk_ref, w_ref, out_ref):
    # xk_ref : (1, K, T_blk)  taps on sublanes, time on lanes
    # w_ref  : (N, K)
    # out_ref: (1, N, T_blk)  -> written directly in [B, N, T_out] layout
    acc = jnp.dot(w_ref[...], xk_ref[0], preferred_element_type=jnp.float32)  # [N, T_blk]
    out_ref[0] = jnp.maximum(acc, 0.0).astype(out_ref.dtype)


def _round_up(x, m):
    return ((x + m - 1) // m) * m


def encoder_forward(x, weight, kernel_size, stride, *, t_tile=16384, out_dtype=None):
    """x: [B, L].  weight: [N, 1, K] (PyTorch Conv1d layout).  Returns [B, N, T_out]."""
    B, L = x.shape
    N, Cin, K = weight.shape
    assert Cin == 1 and K == kernel_size
    T_out = (L - kernel_size) // stride + 1
    assert T_out >= 1
    out_dtype = jnp.dtype(x.dtype) if out_dtype is None else jnp.dtype(out_dtype)

    # --- glue (plain JAX, small vs. the N*T_out output): tap-major framing ---------------
    # xk[b, k, t] = x[b, t*stride + k]; each row is a cheap strided slice (no gather).
    last = (T_out - 1) * stride
    xk = jnp.stack(
        [x[:, k : k + last + 1 : stride] for k in range(kernel_size)], axis=1
    )                                            # [B, K, T_out]
    w2 = weight.reshape(N, kernel_size)          # [N, K]

    # --- time-tile selection (balanced, lane-aligned, VMEM- and megacore-aware) ----------
    in_item = jnp.dtype(x.dtype).itemsize
    out_item = out_dtype.itemsize
    # Double-buffered VMEM bytes per lane of time tile: output block + sublane-padded xk.
    bytes_per_t = 2 * N * out_item + 2 * _round_up(kernel_size, 8) * in_item
    # Keep the working set comfortably inside v7x's 32 MiB scoped VMEM (64 MiB physical).
    t_vmem_max = max(128, ((24 << 20) // bytes_per_t) // 128 * 128)
    t_cap = max(128, min(int(t_tile), t_vmem_max, _round_up(T_out, 128)))

    n_t = pl.cdiv(T_out, t_cap)
    # v7x megacore: prefer an even number of (batch x time) parallel grid steps, but never
    # shrink tiles below the per-step-overhead sweet spot just to get parallelism.
    if (B * n_t) % 2 == 1 and pl.cdiv(T_out, n_t + 1) >= 1024:
        n_t += 1
    # Balance tiles: choose n_tiles first, then round the tile up to a multiple of 128,
    # so there is no tiny ragged final tile (all stores stay full lane-width).
    t_blk = min(_round_up(pl.cdiv(T_out, n_t), 128), _round_up(T_out, 128))
    n_t = pl.cdiv(T_out, t_blk)
    grid = (B, n_t)

    # Raise scoped VMEM only if the double-buffered tile would overflow v5e's 16 MiB default;
    # stay <= 30 MiB so it also fits v6e/v7x scoped defaults.
    blk_bytes = bytes_per_t * t_blk + N * _round_up(kernel_size, 128) * 4 + (1 << 16)
    vmem_limit = None
    if blk_bytes > (12 << 20):
        vmem_limit = int(min(_round_up(blk_bytes * 5 // 4, 1 << 20), 30 << 20))

    out = pl.pallas_call(
        _encoder_kernel,
        out_shape=jax.ShapeDtypeStruct((B, N, T_out), out_dtype),
        grid=grid,
        in_specs=[
            pl.BlockSpec((1, kernel_size, t_blk), lambda b, j: (b, 0, j)),
            pl.BlockSpec((N, kernel_size), lambda b, j: (0, 0)),
        ],
        out_specs=pl.BlockSpec((1, N, t_blk), lambda b, j: (b, 0, j)),
        compiler_params=pltpu.CompilerParams(
            dimension_semantics=("parallel", "parallel"),
            vmem_limit_bytes=vmem_limit,
        ),
    )(xk, w2)
    return out


def _reference(x, weight, kernel_size, stride):
    B, L = x.shape
    N = weight.shape[0]
    T_out = (L - kernel_size) // stride + 1
    idx = jnp.arange(T_out)[:, None] * stride + jnp.arange(kernel_size)[None, :]
    frames = x[:, idx]                                    # [B, T_out, K]
    ref = jnp.einsum("btk,nk->bnt", frames, weight.reshape(N, kernel_size))
    return jnp.maximum(ref, 0.0)


if __name__ == "__main__":
    # Module hyperparams (Encoder(kernel_size=4, out_channels=64), stride = K // 2).
    kernel_size = 4
    stride = kernel_size // 2
    out_channels = 64
    in_channels = 1

    key = jax.random.PRNGKey(0)
    kx, kw, kx2 = jax.random.split(key, 3)

    # Small primary test: B=2, L=128 -> T_out = 63 (single tile, masked edge store).
    B, L = 2, 128
    x = jax.random.normal(kx, (B, L), dtype=jnp.float32)
    weight = jax.random.normal(kw, (out_channels, in_channels, kernel_size),
                               dtype=jnp.float32) * (1.0 / jnp.sqrt(kernel_size))

    y = encoder_forward(x, weight, kernel_size, stride)
    y = jax.block_until_ready(y)
    T_out = (L - kernel_size) // stride + 1
    ref = _reference(x, weight, kernel_size, stride)
    assert y.shape == (B, out_channels, T_out), y.shape
    assert jnp.allclose(y, ref, atol=1e-5, rtol=1e-5)

    # Secondary test exercising the multi-tile path and balanced ragged last tile
    # (force a small tile cap so the grid has several time tiles).
    B2, L2 = 2, 2000                      # -> T_out = 999, t_blk = 256, grid = (2, 4)
    x2 = jax.random.normal(kx2, (B2, L2), dtype=jnp.float32)
    y2 = encoder_forward(x2, weight, kernel_size, stride, t_tile=256)
    y2 = jax.block_until_ready(y2)
    ref2 = _reference(x2, weight, kernel_size, stride)
    assert y2.shape == ref2.shape, y2.shape
    assert jnp.allclose(y2, ref2, atol=1e-5, rtol=1e-5)

    print("KERNEL_OK")
</pallas_src>

<mosaic_0001>
module attributes {stable_mosaic.version = 11 : i64} {
  func.func @_encoder_kernel(%arg0: i32, %arg1: i32, %arg2: memref<1x4x128xf32, #tpu.memory_space<vmem>>, %arg3: memref<64x4xf32, #tpu.memory_space<vmem>>, %arg4: memref<1x64x128xf32, #tpu.memory_space<vmem>>) attributes {dimension_semantics = [#tpu.dimension_semantics<parallel>, #tpu.dimension_semantics<parallel>], iteration_bounds = array<i64: 2, 1>, scalar_prefetch = 0 : i64, scratch_operands = 0 : i64, tpu.core_type = #tpu.core_type<tc>, window_params = [{transform_indices = @transform_0, window_bounds = array<i64: 1, 4, 128>}, {pipeline_mode = #tpu.pipeline_mode<synchronous>, transform_indices = @transform_1, window_bounds = array<i64: 64, 4>}, {transform_indices = @transform_2, window_bounds = array<i64: 1, 64, 128>}]} {
    %c0 = arith.constant 0 : index
    %c0_0 = arith.constant 0 : index
    %0 = vector.load %arg3[%c0, %c0_0] : memref<64x4xf32, #tpu.memory_space<vmem>>, vector<64x4xf32>
    %c0_1 = arith.constant 0 : index
    %c0_2 = arith.constant 0 : index
    %c0_3 = arith.constant 0 : index
    %1 = vector.load %arg2[%c0_1, %c0_2, %c0_3] : memref<1x4x128xf32, #tpu.memory_space<vmem>>, vector<1x4x128xf32>
    %2 = vector.shape_cast %1 : vector<1x4x128xf32> to vector<4x128xf32>
    %cst = arith.constant dense<0.000000e+00> : vector<64x128xf32>
    %3 = tpu.matmul %0, %2, %cst {dimension_numbers = #tpu.dot_dimension_numbers<[1], [0], [0], [1], [0, 0, 1, 1], [], []>} : vector<64x4xf32>, vector<4x128xf32>, vector<64x128xf32> -> vector<64x128xf32>
    %cst_4 = arith.constant 0.000000e+00 : f32
    %4 = vector.broadcast %cst_4 : f32 to vector<64x128xf32>
    %5 = arith.maximumf %3, %4 : vector<64x128xf32>
    %c0_5 = arith.constant 0 : index
    %c0_6 = arith.constant 0 : index
    %c0_7 = arith.constant 0 : index
    %6 = vector.load %arg4[%c0_5, %c0_6, %c0_7] : memref<1x64x128xf32, #tpu.memory_space<vmem>>, vector<1x64x128xf32>
    %7 = vector.shape_cast %6 : vector<1x64x128xf32> to vector<64x128xf32>
    %8 = vector.shape_cast %5 : vector<64x128xf32> to vector<1x64x128xf32>
    tpu.vector_store %arg4[%c0_5, %c0_6, %c0_7], %8 {strides = array<i32>} : memref<1x64x128xf32, #tpu.memory_space<vmem>>, vector<1x64x128xf32>,
    return
  }
  func.func @transform_0(%arg0: i32, %arg1: i32) -> (i32, i32, i32) {
    %c0_i32 = arith.constant 0 : i32
    %c0_i32_0 = arith.constant 0 : i32
    return %arg0, %c0_i32, %arg1 : i32, i32, i32
  }
  func.func @transform_1(%arg0: i32, %arg1: i32) -> (i32, i32) {
    %c0_i32 = arith.constant 0 : i32
    %c0_i32_0 = arith.constant 0 : i32
    %c0_i32_1 = arith.constant 0 : i32
    return %c0_i32, %c0_i32_0 : i32, i32
  }
  func.func @transform_2(%arg0: i32, %arg1: i32) -> (i32, i32, i32) {
    %c0_i32 = arith.constant 0 : i32
    %c0_i32_0 = arith.constant 0 : i32
    return %arg0, %c0_i32, %arg1 : i32, i32, i32
  }
}

</mosaic_0001>

<bundles_post_ra>
// kernel: tpu_custom_call.1
= control target key start
LH: loop header
LB: loop body
LE: loop exit
PB: predicated region body
PF: predicated region fallthrough
CT: control target
= control target key end

     0   :  { %s519_s9 = smov 0   ;;  %s521_s10 = smov 0   ;;  %s584_s0 = inlined_call_operand.vmem [shape: f32[2,4,63], index: 0, kind: input, shape index: {}]   ;;  %s585_s1 = inlined_call_operand.vmem [shape: f32[64,4], index: 1, kind: input, shape index: {}]   ;;  %s586_s2 = inlined_call_operand.vmem [shape: f32[2,64,63], index: 2, kind: output, shape index: {}]  }
   0x1   :  { %s523_s11 = smov 0  }
   0x2 LB: > { %s24_s12 = sadd.s32 1, %s498_s10  ;;  %p415_p0 = scmp.ge.s32.totalorder %s502_s11, 1  ;;  %s502_s11 = sphi %s523_s11, %s12_s11   ;;  %s498_s10 = sphi %s521_s10, %s588_s10   ;;  %s494_s9 = sphi %s519_s9, %s587_s9  }
   0x3   : > { %p26_p1 = scmp.ge.s32.totalorder %s24_s12, 2  ;;  %p130_p2 = scmp.lt.s32.totalorder %s502_s11, 3 }
   0x5   : > { %s590_s12 = smov (%p26_p1, %s24_s12), 0  ;;  %p131_p3 = pnand %p415_p0, %p130_p2 }
   0x6   : > { %p157_p4 = scmp.lt.s32.totalorder (!%p131_p3), %s494_s9, 1 }
   0x7   : > { %134 = sbr.rel (%p131_p3) target bundleno = 220 (0xdc), region = 28 }
   0xc   : > { %v172_v0 = vld [vmem:[%s585_s1] sm:$0xff]  ;;  %vm181_vm0 = vcmask 31744   ;;  %s592_s9 = smov (!%p157_p4, %s494_s9), 1  ;;  %vm206_vm1 = vcmask 1043456   ;;  %v173_v3 = vld [vmem:[%s585_s1 + $0x8] sm:$0xff]  ;;  %v174_v5 = vld [vmem:[%s585_s1 + $0x10] sm:$0xff] }
   0xd   : > { %v176_v1 = vld [vmem:[%s585_s1 + $0x20] sm:$0xff]  ;;  %442 = vmatprep.mubr.msk.f32.mxu0 %vm181_vm0, %v172_v0  ;;  %s416_s17 = sshll.u32 %s592_s9, 2  ;;  %v177_v4 = vld [vmem:[%s585_s1 + $0x28] sm:$0xff]  ;;  %v178_v6 = vld [vmem:[%s585_s1 + $0x30] sm:$0xff]  ;;  %s430_s5 = sshll.u32 %s592_s9, 6 }
   0xe   : > { %448 = vmatprep.mubr.msk.f32.mxu1 %vm181_vm0, %v176_v1  ;;  %s163_s20 = scalar_lea.vmem %s584_s0, %s416_s17  ;;  %v175_v7 = vld [vmem:[%s585_s1 + $0x18] sm:$0xff]  ;;  %s171_s8 = scalar_lea.vmem %s586_s2, %s430_s5 }
   0xf   : > { %v180_v2 = vld [vmem:[%s163_s20] sm:$0xf]  ;;  %v179_v8 = vld [vmem:[%s585_s1 + $0x38] sm:$0xff] }
  0x10   : > { %440 = vmatprep.subr.msk.mxu0 %vm206_vm1, %v180_v2  ;;  %454 = vmatprep.subr.msk.mxu1 %vm206_vm1, %v180_v2 }
  0x11   : > { %441 = vmatpush3.msk.msra.mxu0 %vm206_vm1, %v180_v2  ;;  %455 = vmatpush3.msk.msra.mxu1 %vm206_vm1, %v180_v2 }
  0x12   : > { %443 = vmatmul.mubr.msk.f32.vlgmr.msra.gmra.mxu0 %vm181_vm0, %v173_v3  ;;  %449 = vmatmul.mubr.msk.f32.vlgmr.msra.gmra.mxu1 %vm181_vm0, %v177_v4 }
  0x13   : > { %445 = vmatprep.mubr.msk.f32.mxu0 %vm181_vm0, %v174_v5  ;;  %451 = vmatprep.mubr.msk.f32.mxu1 %vm181_vm0, %v178_v6 }
  0x16   : > { %446 = vmatmul.mubr.msk.f32.gmra.mxu0 %vm181_vm0, %v175_v7  ;;  %452 = vmatmul.mubr.msk.f32.gmra.mxu1 %vm181_vm0, %v179_v8 }
  0xd2   : > { %v444_v9 = vpop.f32.mrf.mxu0  ;;  %v450_v10 = vpop.f32.mrf.mxu1 }
  0xd3   : > { %v316_v11 = vmax.f32 %v444_v9, 0.0  ;;  %v320_v12 = vmax.f32 %v450_v10, 0.0 }
  0xd4   : > { %v276_v13 = vpop.f32.mrf.mxu0  ;;  %v296_v14 = vpop.f32.mrf.mxu1 }
  0xd5   : > { %324 = vst [vmem:[%s171_s8 + $0x8] sm:$0xff] %v316_v11  ;;  %328 = vst [vmem:[%s171_s8 + $0x28] sm:$0xff] %v320_v12  ;;  %v315_v15 = vmax.f32 %v276_v13, 0.0  ;;  %v319_v16 = vmax.f32 %v296_v14, 0.0 }
  0xd6   : > { %v447_v17 = vpop.f32.mrf.mxu0  ;;  %v453_v18 = vpop.f32.mrf.mxu1 }
  0xd7   : > { %323 = vst [vmem:[%s171_s8] sm:$0xff] %v315_v15  ;;  %327 = vst [vmem:[%s171_s8 + $0x20] sm:$0xff] %v319_v16  ;;  %v318_v19 = vmax.f32 %v447_v17, 0.0  ;;  %v322_v20 = vmax.f32 %v453_v18, 0.0 }
  0xd8   : > { %v286_v21 = vpop.f32.mrf.mxu0  ;;  %v306_v22 = vpop.f32.mrf.mxu1 }
  0xd9   : > { %326 = vst [vmem:[%s171_s8 + $0x18] sm:$0xff] %v318_v19  ;;  %330 = vst [vmem:[%s171_s8 + $0x38] sm:$0xff] %v322_v20  ;;  %v317_v23 = vmax.f32 %v286_v21, 0.0  ;;  %v321_v24 = vmax.f32 %v306_v22, 0.0 }
  0xdb   : > { %325 = vst [vmem:[%s171_s8 + $0x10] sm:$0xff] %v317_v23  ;;  %329 = vst [vmem:[%s171_s8 + $0x30] sm:$0xff] %v321_v24 }
  0xdc PF: > { %s12_s11 = sadd.s32 1, %s502_s11   ;;  %s587_s9 = smov %s498_s10 }
  0xdd   : > { %p9_p5 = scmp.ge.s32.totalorder %s12_s11, 4   ;;  %s588_s10 = smov %s590_s12 }
  0xdf   :  { %11 = sbr.rel (!%p9_p5) target bundleno = 2 (0x2), region = 58 }

</bundles_post_ra>
